<compile_context>
chip_gen: v6e
topology: v6e:2x2x1
jax: 0.10.0
libtpu: 0.0.40
codegen_flags: <defaults>
</compile_context>

<pallas_src>
import functools

import jax
import jax.numpy as jnp
from jax.experimental import pallas as pl
from jax.experimental.pallas import tpu as pltpu


def _vit_encoder_kernel(x_ref, w_ref, cls_ref, pe_ref, o_ref, *, bt, S,
                        compute_dtype):
    """One batch-tile per grid step.

    x_ref  : (bt*S, P)    patch pixels in their ORIGINAL dtype (cast in-kernel)
    w_ref  : (P, D)       compute-dtype pre-transposed projection weight
    cls_ref: (1, D)       f32  class_token + pos_enc[0]  (batch-invariant)
    pe_ref : (S, D)       f32  pos_enc[1:]
    o_ref  : (bt, S+1, D) output block
    """
    D = o_ref.shape[-1]
    # Cast here, not in the wrapper: a wrapper-side astype is a separate XLA
    # pass over x in HBM; the in-kernel VPU convert is free filler under the
    # input DMA.
    a = x_ref[...].astype(compute_dtype)
    # Hot path: one big MXU matmul with f32 accumulation.
    proj = jnp.dot(a, w_ref[...], preferred_element_type=jnp.float32)  # (bt*S, D)
    body = proj.reshape(bt, S, D) + pe_ref[...][None, :, :]            # f32 epilogue
    o_ref[:, pl.ds(1, S), :] = body.astype(o_ref.dtype)
    # Batch-invariant row 0 (class token + pos_enc[0]); folded into the same
    # block so it adds no extra HBM traffic.
    cls_row = jnp.broadcast_to(cls_ref[...][None, :, :], (bt, 1, D))
    o_ref[:, pl.ds(0, 1), :] = cls_row.astype(o_ref.dtype)


def _default_vmem_limit_bytes():
    """Per-generation scoped-VMEM limit shared by the tile picker and compiler.

    v5e/v6e have 128 MiB of VMEM per TensorCore -> use 96 MiB.
    v7x has 64 MiB per TensorCore -> stay <= 48 MiB.
    Unknown / query failure -> conservative 48 MiB (safe on every generation).
    """
    try:
        cap = int(pltpu.get_tpu_info().vmem_capacity_bytes)
    except Exception:  # pragma: no cover - older jax or query failure
        cap = 64 * 1024 * 1024
    if cap >= 128 * 1024 * 1024:
        return 96 * 1024 * 1024
    return min(48 * 1024 * 1024, (cap * 3) // 4)


def _pick_batch_tile(B, S, P, D, *, vmem_budget, x_bytes, out_bytes, w_bytes):
    """Largest batch tile whose double-buffered footprint fits `vmem_budget`,
    capped so the grid has >= 2 steps (v7x megacore + DMA/compute overlap).

    bt need not divide B (the wrapper pads the batch); it only has to keep the
    x block's row count (bt*S) sublane-aligned (multiple of 8).
    """
    # Granularity so (bt*S) % 8 == 0.
    g = 1
    while (g * S) % 8:
        g += 1

    def fits(bt):
        per_step = 2 * bt * S * P * x_bytes + 2 * bt * (S + 1) * D * out_bytes
        resident = 2 * (P * D * w_bytes + (S + 1) * D * 4)
        return per_step + resident <= vmem_budget

    # >= 2 grid steps when possible; granularity is a hard (correctness) floor.
    cap = -(-B // 2) if B >= 2 else B
    cap = max(g, (cap // g) * g)

    bt = g
    for cand in range(g, cap + 1, g):
        if fits(cand):
            bt = cand
    # Note: taking the largest fitting bt also drives bt*S toward >=256 rows
    # (v6e/v7x MXU fill) whenever B and VMEM allow it.
    return bt


def vit_encoder(x, w_proj, class_token, pos_enc, *, batch_tile=None,
                compute_dtype=jnp.bfloat16, out_dtype=jnp.float32,
                vmem_limit_bytes=None):
    """x: (B, S, P); w_proj: (D, P) [nn.Linear(P->D, bias=False) weight];
    class_token: (D,); pos_enc: (S+1, D).  Returns (B, S+1, D) in out_dtype."""
    B, S, P = x.shape
    D = w_proj.shape[0]
    if pos_enc.shape != (S + 1, D):
        raise NotImplementedError("Proper interpolation is not implemented yet")

    if vmem_limit_bytes is None:
        vmem_limit_bytes = _default_vmem_limit_bytes()

    x_bytes = jnp.dtype(x.dtype).itemsize
    out_bytes = jnp.dtype(out_dtype).itemsize
    w_bytes = jnp.dtype(compute_dtype).itemsize

    if batch_tile is None:
        bt = _pick_batch_tile(
            B, S, P, D,
            vmem_budget=int(vmem_limit_bytes * 0.8),   # headroom under the limit
            x_bytes=x_bytes, out_bytes=out_bytes, w_bytes=w_bytes)
    else:
        bt = batch_tile

    # Non-divisor bt: pad the batch (a few rows) instead of collapsing bt to 1.
    B_pad = -(-B // bt) * bt

    # Layout prep (cheap / free one-shot ops, off the kernel hot path).
    x_rows = x.reshape(B * S, P)                       # contiguous reshape, NO cast
    if B_pad != B:
        x_rows = jnp.pad(x_rows, ((0, (B_pad - B) * S), (0, 0)))
    w_pd = w_proj.T.astype(compute_dtype)              # (P, D): no in-kernel transpose
    cls_pe0 = (class_token.reshape(1, D).astype(jnp.float32)
               + pos_enc[0:1, :].astype(jnp.float32))  # (1, D) batch-invariant row
    pe_rest = pos_enc[1:, :].astype(jnp.float32)       # (S, D)

    kernel = functools.partial(_vit_encoder_kernel, bt=bt, S=S,
                               compute_dtype=compute_dtype)
    out = pl.pallas_call(
        kernel,
        out_shape=jax.ShapeDtypeStruct((B_pad, S + 1, D), out_dtype),
        grid_spec=pltpu.PrefetchScalarGridSpec(
            num_scalar_prefetch=0,
            grid=(B_pad // bt,),
            in_specs=[
                pl.BlockSpec((bt * S, P), lambda i: (i, 0)),   # streamed per step
                pl.BlockSpec((P, D), lambda i: (0, 0)),        # grid-invariant
                pl.BlockSpec((1, D), lambda i: (0, 0)),        # grid-invariant
                pl.BlockSpec((S, D), lambda i: (0, 0)),        # grid-invariant
            ],
            out_specs=pl.BlockSpec((bt, S + 1, D), lambda i: (i, 0, 0)),
        ),
        compiler_params=pltpu.CompilerParams(
            dimension_semantics=("parallel",),   # >=2 steps -> shards across v7x TCs
            vmem_limit_bytes=int(vmem_limit_bytes),
        ),
    )(x_rows, w_pd, cls_pe0, pe_rest)
    if B_pad != B:
        out = out[:B]
    # TODO(synk): TransformerEncoder (self.tfenc) definition was not provided in
    # the source module, so it is treated as identity here.
    return out


if __name__ == "__main__":
    # Shapes implied by the module: img_size=16, patch_size=4 -> S = 16;
    # csize=4 -> P = 4 * 4**2 = 64; dsize=32 -> D = 32.
    B, S, P, D = 2, 16, 64, 32

    key = jax.random.PRNGKey(0)
    kx, kw, kc, kp = jax.random.split(key, 4)
    x = jax.random.normal(kx, (B, S, P), dtype=jnp.float32)
    w_proj = jax.random.normal(kw, (D, P), dtype=jnp.float32) * 0.05  # Linear(P->D, bias=False)
    class_token = jax.random.normal(kc, (D,), dtype=jnp.float32)      # nn.Parameter(dsize)
    pos_enc = jax.random.normal(kp, (S + 1, D), dtype=jnp.float32)    # nn.Parameter(S+1, dsize)

    out = jax.block_until_ready(vit_encoder(x, w_proj, class_token, pos_enc))

    # Pure-JAX reference at matching precision (bf16 matmul inputs, f32 accumulation).
    x_c = x.reshape(B * S, P).astype(jnp.bfloat16)
    w_c = w_proj.T.astype(jnp.bfloat16)
    ref_proj = jnp.dot(x_c, w_c,
                       preferred_element_type=jnp.float32).reshape(B, S, D)
    ref = jnp.concatenate(
        [jnp.broadcast_to(class_token[None, None, :], (B, 1, D)), ref_proj],
        axis=1,
    ) + pos_enc[None, :, :].astype(jnp.float32)

    assert out.shape == (B, S + 1, D), out.shape
    assert jnp.allclose(out, ref, atol=2e-3, rtol=2e-3), "mismatch vs reference"
    print("KERNEL_OK")
</pallas_src>

<mosaic_0001>
module attributes {stable_mosaic.version = 11 : i64} {
  func.func @_vit_encoder_kernel(%arg0: i32, %arg1: memref<16x64xf32, #tpu.memory_space<vmem>>, %arg2: memref<64x32xbf16, #tpu.memory_space<vmem>>, %arg3: memref<1x32xf32, #tpu.memory_space<vmem>>, %arg4: memref<16x32xf32, #tpu.memory_space<vmem>>, %arg5: memref<1x17x32xf32, #tpu.memory_space<vmem>>) attributes {dimension_semantics = [#tpu.dimension_semantics<parallel>], iteration_bounds = array<i64: 2>, scalar_prefetch = 0 : i64, scratch_operands = 0 : i64, tpu.core_type = #tpu.core_type<tc>, window_params = [{transform_indices = @transform_0, window_bounds = array<i64: 16, 64>}, {pipeline_mode = #tpu.pipeline_mode<synchronous>, transform_indices = @transform_1, window_bounds = array<i64: 64, 32>}, {pipeline_mode = #tpu.pipeline_mode<synchronous>, transform_indices = @transform_2, window_bounds = array<i64: 1, 32>}, {pipeline_mode = #tpu.pipeline_mode<synchronous>, transform_indices = @transform_3, window_bounds = array<i64: 16, 32>}, {transform_indices = @transform_4, window_bounds = array<i64: 1, 17, 32>}]} {
    %c0 = arith.constant 0 : index
    %c0_0 = arith.constant 0 : index
    %0 = vector.load %arg1[%c0, %c0_0] : memref<16x64xf32, #tpu.memory_space<vmem>>, vector<16x64xf32>
    %1 = arith.truncf %0 : vector<16x64xf32> to vector<16x64xbf16>
    %c0_1 = arith.constant 0 : index
    %c0_2 = arith.constant 0 : index
    %2 = vector.load %arg2[%c0_1, %c0_2] : memref<64x32xbf16, #tpu.memory_space<vmem>>, vector<64x32xbf16>
    %cst = arith.constant dense<0.000000e+00> : vector<16x32xf32>
    %3 = tpu.matmul %1, %2, %cst {dimension_numbers = #tpu.dot_dimension_numbers<[1], [0], [0], [1], [0, 0, 1, 1], [], []>} : vector<16x64xbf16>, vector<64x32xbf16>, vector<16x32xf32> -> vector<16x32xf32>
    %4 = vector.shape_cast %3 : vector<16x32xf32> to vector<1x16x32xf32>
    %c0_3 = arith.constant 0 : index
    %c0_4 = arith.constant 0 : index
    %5 = vector.load %arg4[%c0_3, %c0_4] : memref<16x32xf32, #tpu.memory_space<vmem>>, vector<16x32xf32>
    %6 = vector.shape_cast %5 : vector<16x32xf32> to vector<1x16x32xf32>
    %7 = arith.addf %4, %6 : vector<1x16x32xf32>
    %c0_5 = arith.constant 0 : index
    %c1 = arith.constant 1 : index
    %c0_6 = arith.constant 0 : index
    %8 = vector.load %arg5[%c0_5, %c1, %c0_6] : memref<1x17x32xf32, #tpu.memory_space<vmem>>, vector<1x16x32xf32>
    tpu.vector_store %arg5[%c0_5, %c1, %c0_6], %7 {strides = array<i32>} : memref<1x17x32xf32, #tpu.memory_space<vmem>>, vector<1x16x32xf32>,
    %c0_7 = arith.constant 0 : index
    %c0_8 = arith.constant 0 : index
    %9 = vector.load %arg3[%c0_7, %c0_8] : memref<1x32xf32, #tpu.memory_space<vmem>>, vector<1x32xf32>
    %10 = vector.shape_cast %9 : vector<1x32xf32> to vector<1x1x32xf32>
    %c0_9 = arith.constant 0 : index
    %c0_10 = arith.constant 0 : index
    %c0_11 = arith.constant 0 : index
    %11 = vector.load %arg5[%c0_9, %c0_10, %c0_11] : memref<1x17x32xf32, #tpu.memory_space<vmem>>, vector<1x1x32xf32>
    tpu.vector_store %arg5[%c0_9, %c0_10, %c0_11], %10 {strides = array<i32>} : memref<1x17x32xf32, #tpu.memory_space<vmem>>, vector<1x1x32xf32>,
    return
  }
  func.func @transform_0(%arg0: i32) -> (i32, i32) {
    %c0_i32 = arith.constant 0 : i32
    %c0_i32_0 = arith.constant 0 : i32
    return %arg0, %c0_i32 : i32, i32
  }
  func.func @transform_1(%arg0: i32) -> (i32, i32) {
    %c0_i32 = arith.constant 0 : i32
    %c0_i32_0 = arith.constant 0 : i32
    %c0_i32_1 = arith.constant 0 : i32
    return %c0_i32, %c0_i32_0 : i32, i32
  }
  func.func @transform_2(%arg0: i32) -> (i32, i32) {
    %c0_i32 = arith.constant 0 : i32
    %c0_i32_0 = arith.constant 0 : i32
    %c0_i32_1 = arith.constant 0 : i32
    return %c0_i32, %c0_i32_0 : i32, i32
  }
  func.func @transform_3(%arg0: i32) -> (i32, i32) {
    %c0_i32 = arith.constant 0 : i32
    %c0_i32_0 = arith.constant 0 : i32
    %c0_i32_1 = arith.constant 0 : i32
    return %c0_i32, %c0_i32_0 : i32, i32
  }
  func.func @transform_4(%arg0: i32) -> (i32, i32, i32) {
    %c0_i32 = arith.constant 0 : i32
    %c0_i32_0 = arith.constant 0 : i32
    %c0_i32_1 = arith.constant 0 : i32
    return %arg0, %c0_i32, %c0_i32_0 : i32, i32, i32
  }
}

</mosaic_0001>

<bundles_post_ra>
// kernel: tpu_custom_call.1
= control target key start
LH: loop header
LB: loop body
LE: loop exit
PB: predicated region body
PF: predicated region fallthrough
CT: control target
= control target key end

     0   :  { %s428_s15 = smov 0   ;;  %s471_s0 = inlined_call_operand.vmem [shape: f32[32,64], index: 0, kind: input, shape index: {}]   ;;  %s472_s1 = inlined_call_operand.vmem [shape: bf16[64,32], index: 1, kind: input, shape index: {}]   ;;  %s473_s2 = inlined_call_operand.vmem [shape: f32[1,32], index: 2, kind: input, shape index: {}]   ;;  %s474_s3 = inlined_call_operand.vmem [shape: f32[16,32], index: 3, kind: input, shape index: {}]   ;;  %s475_s4 = inlined_call_operand.vmem [shape: f32[2,17,32], index: 4, kind: output, shape index: {}]  }
   0x1 LB: > { %s434_s16 = sadd.s32 4294967295, %s399_s15   ;;  %p350_p0 = scmp.ge.s32.totalorder %s399_s15, 1  ;;  %s399_s15 = sphi %s428_s15, %s14_s15  }
   0x2   : > { %p163_p1 = scmp.lt.s32.totalorder %s399_s15, 3 }
   0x4   : > { %p164_p2 = pnand %p350_p0, %p163_p1 }
   0x5   : > { %s351_s21 = sshll.u32 (!%p164_p2), %s434_s16, 1  ;;  %p195_p4 = scmp.lt.s32.totalorder (!%p164_p2), %s434_s16, 1 }
   0x6   : > { %167 = sbr.rel (%p164_p2) target bundleno = 228 (0xe4), region = 36  ;;  %p190_p3 = scmp.lt.s32.totalorder (!%p164_p2), %s351_s21, 3 }
   0xb   : > { %v389_v0 = vld [vmem:[%s472_s1 + $0x18] sm:$0xff]   ;;  %v401_v1 = vmov 0.0   ;;  %v390_v2 = vld [vmem:[%s472_s1 + $0x10] sm:$0xff]   ;;  %vm402_vm0 = vmmov 0   ;;  %s477_s21 = smov (!%p190_p3, %s351_s21), 3  ;;  %v391_v3 = vld [vmem:[%s472_s1 + $0x8] sm:$0xff]  }
   0xc   : > { %366 = vmatprep.subr.bf16.mxu0 %v401_v1  ;;  %374 = vmatprep.mubr.msk.bf16.mxu0 %vm402_vm0, %v401_v1  ;;  %s352_s24 = sshll.u32 %s477_s21, 3  ;;  %v392_v4 = vld [vmem:[%s472_s1] sm:$0xff]   ;;  %vm236_vm1 = vcmask 523264   ;;  %s479_s16 = smov (!%p195_p4, %s434_s16), 1  ;;  %vm289_vm2 = vcmask 253952   ;;  %vm285_vm3 = vcmask 261120  }
   0xd   : > { %367 = vmatpush3.bf16.msra.mxu0 %v389_v0  ;;  %s193_s27 = scalar_lea.vmem %s471_s0, %s352_s24  ;;  %s378_s30 = smul.u32 24, %s479_s16  ;;  %v288_v8 = vld [vmem:[%s473_s2] sm:$0x1]  ;;  %v282_v13 = vld [vmem:[%s474_s3 + $0x8] sm:$0xff] }
   0xe   : > { %368 = vmatprep.subr.bf16.mxu0 %v401_v1  ;;  %v201_v5 = vld [vmem:[%s193_s27] sm:$0xff]  ;;  %v202_v6 = vld [vmem:[%s193_s27 + $0x8] sm:$0xff] }
   0xf   : > { %v203_v7 = vpack.c.bf16 %v202_v6, %v201_v5  ;;  %s199_s7 = scalar_lea.vmem %s475_s4, %s378_s30  ;;  %v281_v9 = vld [vmem:[%s474_s3] sm:$0xff] }
  0x10   : > { %290 = vst.msk [vmem:[%s199_s7] sm:$0x1] %vm289_vm2, %v288_v8 }
  0x11   : > { %369 = vmatpush3.bf16.msra.mxu0 %v390_v2 }
  0x12   : > { %370 = vmatprep.subr.bf16.mxu0 %v401_v1 }
  0x15   : > { %371 = vmatpush3.bf16.msra.mxu0 %v391_v3 }
  0x16   : > { %372 = vmatprep.subr.bf16.mxu0 %v401_v1 }
  0x19   : > { %373 = vmatpush3.bf16.msra.mxu0 %v392_v4 }
  0x1c   : > { %375 = vmatmul.mubr.msk.bf16.vlgmr.msra.gmra.mxu0 %vm236_vm1, %v203_v7 }
  0xdc   : > { %v274_v10 = vpop.f32.mrf.mxu0 }
  0xdd   : > { %v283_v11 = vadd.f32 %v281_v9, %v274_v10 }
  0xde   : > { %v376_v12 = vpop.f32.mrf.mxu0 }
  0xdf   : > { %286 = vst.msk [vmem:[%s199_s7 + $0x1] sm:$0xff] %vm285_vm3, %v283_v11 }
  0xe0   : > { %v277_v14 = vpop.f32.mrf.mxu0 }
  0xe1   : > { %v284_v15 = vadd.f32 %v282_v13, %v277_v14 }
  0xe2   : > { %v377_v16 = vpop.f32.mrf.mxu0 }
  0xe3   : > { %287 = vst.msk [vmem:[%s199_s7 + $0x9] sm:$0xff] %vm285_vm3, %v284_v15 }
  0xe4 PF: > { %s14_s15 = sadd.s32 1, %s399_s15  }
  0xe5   : > { %p11_p5 = scmp.ge.s32.totalorder %s14_s15, 4  }
  0xe7   :  { %13 = sbr.rel (!%p11_p5) target bundleno = 1 (0x1), region = 66 }

</bundles_post_ra>
